<compile_context>
chip_gen: v7x
topology: tpu7x:2x2x1
jax: 0.10.0
libtpu: 0.0.40
codegen_flags: <defaults>
</compile_context>

<pallas_src>
import jax
import jax.numpy as jnp
from jax.experimental import pallas as pl
from jax.experimental.pallas import tpu as pltpu


def _round_up(n, m):
    return ((n + m - 1) // m) * m


def _cdiv(a, b):
    return -(-a // b)


def _tpu_vmem_capacity_bytes():
    """Physical per-core VMEM, with a conservative fallback."""
    try:
        info = pltpu.get_tpu_info()
        cap = getattr(info, "vmem_capacity_bytes", None)
        if cap:
            return int(cap)
    except Exception:  # hardware query only affects sizing, never correctness
        pass
    return 128 * 1024 * 1024


# ---------------------------------------------------------------------------
# Kernel
# ---------------------------------------------------------------------------
def _mlp_kernel(x_ref, w1_ref, b1_ref, w2_ref, b2_ref, o_ref, h_ref):
    # x_ref : (tm, Din)  input dtype (cast to bf16 in-kernel)
    # w1_ref: (Din, H)   bf16        b1_ref: (1, H)     f32
    # w2_ref: (H, tn)    bf16        b2_ref: (1, tn)    f32
    # o_ref : (tm, tn)   out dtype   h_ref : (tm, H)    f32 scratch
    @pl.when(pl.program_id(1) == 0)
    def _():
        xb = x_ref[...].astype(jnp.bfloat16)
        h = jnp.dot(xb, w1_ref[...], preferred_element_type=jnp.float32)
        h_ref[...] = jnp.maximum(h + b1_ref[...], 0.0)

    out = jnp.dot(h_ref[...].astype(jnp.bfloat16), w2_ref[...],
                  preferred_element_type=jnp.float32)
    o_ref[...] = (out + b2_ref[...]).astype(o_ref.dtype)


def _vmem_bytes(tm, tn, Din, H, x_item, out_item):
    return (2 * tm * Din * x_item              # x row tiles (double-buffered)
            + 2 * (Din * H * 2 + H * 4)        # w1 (bf16) + b1 (f32)
            + 2 * (H * tn * 2 + tn * 4)        # w2 tile (bf16) + b2 tile (f32)
            + 2 * tm * tn * out_item           # output tiles
            + tm * H * 4)                      # hidden scratch (f32)


def _fused_mlp(x2d, w1, b1, w2, b2, *, out_dim, out_dtype=jnp.float32):
    """x2d: (M, Din) -> (M, out_dim) = relu(x@w1+b1)@w2+b2, f32 accumulation.

    w1/w2 must already be bf16, b1/b2 f32, and w2/b2 lane-padded (prepare_params).
    """
    M, Din = x2d.shape
    H = w1.shape[1]
    Dout_p = w2.shape[1]                     # already a multiple of 128
    x_item = jnp.dtype(x2d.dtype).itemsize
    out_item = jnp.dtype(out_dtype).itemsize

    # ---- generation-aware sizing ------------------------------------------
    cap = _tpu_vmem_capacity_bytes()
    if cap >= (128 << 20):                   # v5e / v6e: 128 MiB physical
        ceiling = 100 << 20
        tm_max = 512
    else:                                    # v7x: 64 MiB per TensorCore
        ceiling = max(32 << 20, cap - (12 << 20))
        tm_max = 256

    tm = min(tm_max, _round_up(max(M, 1), 8))
    tn = Dout_p
    # If resident weights blow the budget, tile the output dim first, then rows.
    while _vmem_bytes(tm, tn, Din, H, x_item, out_item) > ceiling and tn > 256:
        tn = _round_up(tn // 2, 128)
    while _vmem_bytes(tm, tn, Din, H, x_item, out_item) > ceiling and tm > 8:
        tm = _round_up(tm // 2, 8)

    # Balance the ragged row tail: near-equal blocks, no full-block + crumb.
    tm = _round_up(_cdiv(M, _cdiv(M, tm)), 8)
    # Guarantee >=2 row steps (megacore / 2-TC sharding) when there is work.
    if _cdiv(M, tm) < 2 and M >= 16:
        tm = _round_up(_cdiv(M, 2), 8)

    grid = (_cdiv(M, tm), _cdiv(Dout_p, tn))

    need = _vmem_bytes(tm, tn, Din, H, x_item, out_item)
    vmem_limit = int(min(max(need + need // 2, 32 << 20), ceiling))

    cost = pl.CostEstimate(
        flops=2 * M * (Din * H + H * Dout_p),
        bytes_accessed=(M * Din * x_item + Din * H * 2 + H * 4
                        + H * Dout_p * 2 + Dout_p * 4 + M * Dout_p * out_item),
        transcendentals=0)

    out = pl.pallas_call(
        _mlp_kernel,
        out_shape=jax.ShapeDtypeStruct((M, Dout_p), out_dtype),
        grid=grid,
        in_specs=[
            pl.BlockSpec((tm, Din), lambda i, j: (i, 0)),   # x row tile
            pl.BlockSpec((Din, H), lambda i, j: (0, 0)),    # w1 (resident)
            pl.BlockSpec((1, H), lambda i, j: (0, 0)),      # b1 (resident)
            pl.BlockSpec((H, tn), lambda i, j: (0, j)),     # w2 column tile
            pl.BlockSpec((1, tn), lambda i, j: (0, j)),     # b2 column tile
        ],
        out_specs=pl.BlockSpec((tm, tn), lambda i, j: (i, j)),
        scratch_shapes=[pltpu.VMEM((tm, H), jnp.float32)],  # cached hidden
        compiler_params=pltpu.CompilerParams(
            dimension_semantics=("parallel", "arbitrary"),
            vmem_limit_bytes=vmem_limit),
        cost_estimate=cost,
    )(x2d, w1, b1, w2, b2)

    return out[:, :out_dim] if out_dim != Dout_p else out


# ---------------------------------------------------------------------------
# Module wrapper
# ---------------------------------------------------------------------------
def prepare_params(params):
    """One-time weight prep: bf16 MXU weights, f32 biases, lane-padded Dout.

    Hoisted out of the forward so each call makes exactly one pass over the
    weights (inside the kernel).
    """
    w1 = params["w1"].astype(jnp.bfloat16)
    b1 = params["b1"].reshape(1, -1).astype(jnp.float32)
    w2 = params["w2"]
    b2 = params["b2"].reshape(1, -1)
    out_dim = w2.shape[1]
    dout_p = _round_up(out_dim, 128)
    if dout_p != out_dim:
        w2 = jnp.pad(w2, ((0, 0), (0, dout_p - out_dim)))
        b2 = jnp.pad(b2, ((0, 0), (0, dout_p - out_dim)))
    return {"w1": w1, "b1": b1,
            "w2": w2.astype(jnp.bfloat16), "b2": b2.astype(jnp.float32),
            "out_dim": out_dim}


def encoder_projector_concat(x, prepared, k, *, out_dtype=jnp.float32):
    """JAX/Pallas equivalent of EncoderProjectorConcat.forward.

    x: (B, S, D). Returns (B, S // k, llm_dim) in out_dtype (use bf16 when the
    consumer LLM runs in bf16 to halve output HBM traffic).
    """
    B, S, D = x.shape
    num_discard = S % k
    if num_discard > 0:
        x = x[:, : S - num_discard, :]
    T = x.shape[1] // k
    if T == 0:
        return jnp.zeros((B, 0, prepared["out_dim"]), out_dtype)
    # (B*T, D*k): k consecutive frames stacked along features (cheap reshape).
    x2d = x.reshape(B * T, D * k)
    out2d = _fused_mlp(x2d, prepared["w1"], prepared["b1"],
                       prepared["w2"], prepared["b2"],
                       out_dim=prepared["out_dim"], out_dtype=out_dtype)
    return out2d.reshape(B, T, -1)


def init_params(key, encoder_dim, k, llm_dim, hidden=1024, dtype=jnp.float32):
    """Synthetic params matching nn.Linear shapes (stored (in, out))."""
    k1, k2, k3, k4 = jax.random.split(key, 4)
    din = encoder_dim * k
    w1 = jax.random.normal(k1, (din, hidden), dtype) * (1.0 / jnp.sqrt(din))
    b1 = jax.random.normal(k2, (1, hidden), dtype) * 0.01
    w2 = jax.random.normal(k3, (hidden, llm_dim), dtype) * (1.0 / jnp.sqrt(hidden))
    b2 = jax.random.normal(k4, (1, llm_dim), dtype) * 0.01
    return {"w1": w1, "b1": b1, "w2": w2, "b2": b2}


if __name__ == "__main__":
    # config: speech_encoder_ds_rate=4, speech_encoder_hidden_size=32, hidden_size=64
    k = 4
    encoder_dim = 32
    llm_dim = 64
    B, S = 2, 18  # S % k == 2 -> two trailing frames discarded

    key = jax.random.PRNGKey(0)
    kx, kp = jax.random.split(key)
    x = jax.random.normal(kx, (B, S, encoder_dim), jnp.float32)
    params = init_params(kp, encoder_dim, k, llm_dim)
    prepared = prepare_params(params)   # one-time weight prep (hoisted)

    out = encoder_projector_concat(x, prepared, k)
    out = jax.block_until_ready(out)

    # Reference at matched precision (bf16 matmuls, f32 accumulation/bias).
    T = (S - S % k) // k
    xr = x[:, : S - (S % k), :].reshape(B * T, encoder_dim * k)
    h = jnp.dot(xr.astype(jnp.bfloat16), params["w1"].astype(jnp.bfloat16),
                preferred_element_type=jnp.float32) + params["b1"]
    h = jnp.maximum(h, 0.0)
    ref = jnp.dot(h.astype(jnp.bfloat16), params["w2"].astype(jnp.bfloat16),
                  preferred_element_type=jnp.float32) + params["b2"]
    ref = ref.reshape(B, T, llm_dim)

    assert out.shape == (B, T, llm_dim), out.shape
    assert jnp.allclose(out, ref, atol=1e-2, rtol=1e-2), "mismatch vs reference"

    print("KERNEL_OK")
</pallas_src>

<mosaic_0001>
module attributes {stable_mosaic.version = 11 : i64} {
  func.func @_mlp_kernel(%arg0: i32, %arg1: i32, %arg2: memref<8x128xf32, #tpu.memory_space<vmem>>, %arg3: memref<128x1024xbf16, #tpu.memory_space<vmem>>, %arg4: memref<1x1024xf32, #tpu.memory_space<vmem>>, %arg5: memref<1024x128xbf16, #tpu.memory_space<vmem>>, %arg6: memref<1x128xf32, #tpu.memory_space<vmem>>, %arg7: memref<8x128xf32, #tpu.memory_space<vmem>>, %arg8: memref<8x1024xf32, #tpu.memory_space<vmem>>) attributes {dimension_semantics = [#tpu.dimension_semantics<parallel>, #tpu.dimension_semantics<arbitrary>], iteration_bounds = array<i64: 1, 1>, scalar_prefetch = 0 : i64, scratch_operands = 1 : i64, tpu.core_type = #tpu.core_type<tc>, window_params = [{transform_indices = @transform_0, window_bounds = array<i64: 8, 128>}, {pipeline_mode = #tpu.pipeline_mode<synchronous>, transform_indices = @transform_1, window_bounds = array<i64: 128, 1024>}, {pipeline_mode = #tpu.pipeline_mode<synchronous>, transform_indices = @transform_2, window_bounds = array<i64: 1, 1024>}, {transform_indices = @transform_3, window_bounds = array<i64: 1024, 128>}, {transform_indices = @transform_4, window_bounds = array<i64: 1, 128>}, {transform_indices = @transform_5, window_bounds = array<i64: 8, 128>}]} {
    %c0_i32 = arith.constant 0 : i32
    %0 = arith.cmpi eq, %arg1, %c0_i32 : i32
    %1 = arith.extui %0 : i1 to i32
    %c0_i32_0 = arith.constant 0 : i32
    %2 = arith.cmpi ne, %1, %c0_i32_0 : i32
    scf.if %2 {
      %c0_8 = arith.constant 0 : index
      %c0_9 = arith.constant 0 : index
      %11 = vector.load %arg2[%c0_8, %c0_9] : memref<8x128xf32, #tpu.memory_space<vmem>>, vector<8x128xf32>
      %12 = arith.truncf %11 : vector<8x128xf32> to vector<8x128xbf16>
      %c0_10 = arith.constant 0 : index
      %c0_11 = arith.constant 0 : index
      %13 = vector.load %arg3[%c0_10, %c0_11] : memref<128x1024xbf16, #tpu.memory_space<vmem>>, vector<128x1024xbf16>
      %cst_12 = arith.constant dense<0.000000e+00> : vector<8x1024xf32>
      %14 = tpu.matmul %12, %13, %cst_12 {dimension_numbers = #tpu.dot_dimension_numbers<[1], [0], [0], [1], [0, 0, 1, 1], [], []>} : vector<8x128xbf16>, vector<128x1024xbf16>, vector<8x1024xf32> -> vector<8x1024xf32>
      %c0_13 = arith.constant 0 : index
      %c0_14 = arith.constant 0 : index
      %15 = vector.load %arg4[%c0_13, %c0_14] : memref<1x1024xf32, #tpu.memory_space<vmem>>, vector<1x1024xf32>
      %16 = vector.broadcast %15 : vector<1x1024xf32> to vector<8x1024xf32>
      %17 = arith.addf %14, %16 : vector<8x1024xf32>
      %cst_15 = arith.constant 0.000000e+00 : f32
      %18 = vector.broadcast %cst_15 : f32 to vector<8x1024xf32>
      %19 = arith.maximumf %17, %18 : vector<8x1024xf32>
      %c0_16 = arith.constant 0 : index
      %c0_17 = arith.constant 0 : index
      %20 = vector.load %arg8[%c0_16, %c0_17] : memref<8x1024xf32, #tpu.memory_space<vmem>>, vector<8x1024xf32>
      tpu.vector_store %arg8[%c0_16, %c0_17], %19 {strides = array<i32>} : memref<8x1024xf32, #tpu.memory_space<vmem>>, vector<8x1024xf32>,
    } else {
    }
    %c0 = arith.constant 0 : index
    %c0_1 = arith.constant 0 : index
    %3 = vector.load %arg8[%c0, %c0_1] : memref<8x1024xf32, #tpu.memory_space<vmem>>, vector<8x1024xf32>
    %4 = arith.truncf %3 : vector<8x1024xf32> to vector<8x1024xbf16>
    %c0_2 = arith.constant 0 : index
    %c0_3 = arith.constant 0 : index
    %5 = vector.load %arg5[%c0_2, %c0_3] : memref<1024x128xbf16, #tpu.memory_space<vmem>>, vector<1024x128xbf16>
    %cst = arith.constant dense<0.000000e+00> : vector<8x128xf32>
    %6 = tpu.matmul %4, %5, %cst {dimension_numbers = #tpu.dot_dimension_numbers<[1], [0], [0], [1], [0, 0, 1, 1], [], []>} : vector<8x1024xbf16>, vector<1024x128xbf16>, vector<8x128xf32> -> vector<8x128xf32>
    %c0_4 = arith.constant 0 : index
    %c0_5 = arith.constant 0 : index
    %7 = vector.load %arg6[%c0_4, %c0_5] : memref<1x128xf32, #tpu.memory_space<vmem>>, vector<1x128xf32>
    %8 = vector.broadcast %7 : vector<1x128xf32> to vector<8x128xf32>
    %9 = arith.addf %6, %8 : vector<8x128xf32>
    %c0_6 = arith.constant 0 : index
    %c0_7 = arith.constant 0 : index
    %10 = vector.load %arg7[%c0_6, %c0_7] : memref<8x128xf32, #tpu.memory_space<vmem>>, vector<8x128xf32>
    tpu.vector_store %arg7[%c0_6, %c0_7], %9 {strides = array<i32>} : memref<8x128xf32, #tpu.memory_space<vmem>>, vector<8x128xf32>,
    return
  }
  func.func @transform_0(%arg0: i32, %arg1: i32) -> (i32, i32) {
    %c0_i32 = arith.constant 0 : i32
    %c0_i32_0 = arith.constant 0 : i32
    return %arg0, %c0_i32 : i32, i32
  }
  func.func @transform_1(%arg0: i32, %arg1: i32) -> (i32, i32) {
    %c0_i32 = arith.constant 0 : i32
    %c0_i32_0 = arith.constant 0 : i32
    %c0_i32_1 = arith.constant 0 : i32
    return %c0_i32, %c0_i32_0 : i32, i32
  }
  func.func @transform_2(%arg0: i32, %arg1: i32) -> (i32, i32) {
    %c0_i32 = arith.constant 0 : i32
    %c0_i32_0 = arith.constant 0 : i32
    %c0_i32_1 = arith.constant 0 : i32
    return %c0_i32, %c0_i32_0 : i32, i32
  }
  func.func @transform_3(%arg0: i32, %arg1: i32) -> (i32, i32) {
    %c0_i32 = arith.constant 0 : i32
    %c0_i32_0 = arith.constant 0 : i32
    return %c0_i32, %arg1 : i32, i32
  }
  func.func @transform_4(%arg0: i32, %arg1: i32) -> (i32, i32) {
    %c0_i32 = arith.constant 0 : i32
    %c0_i32_0 = arith.constant 0 : i32
    return %c0_i32, %arg1 : i32, i32
  }
  func.func @transform_5(%arg0: i32, %arg1: i32) -> (i32, i32) {
    %c0_i32 = arith.constant 0 : i32
    return %arg0, %arg1 : i32, i32
  }
}

</mosaic_0001>

<bundles_post_ra>
// kernel: tpu_custom_call.1
= control target key start
LH: loop header
LB: loop body
LE: loop exit
PB: predicated region body
PF: predicated region fallthrough
CT: control target
= control target key end

     0   :  { %10 = vsyncpa [#allocation4], 0  ;;  %s1940_s0 = inlined_call_operand.hbm [shape: f32[8,128], index: 0, kind: input, shape index: {}]   ;;  %s1941_s1 = inlined_call_operand.hbm [shape: bf16[128,1024], index: 1, kind: input, shape index: {}]   ;;  %s1942_s2 = inlined_call_operand.hbm [shape: f32[1,1024], index: 2, kind: input, shape index: {}]   ;;  %s1943_s3 = inlined_call_operand.hbm [shape: bf16[1024,128], index: 3, kind: input, shape index: {}]   ;;  %s1944_s4 = inlined_call_operand.vmem [shape: f32[1,128], index: 4, kind: input, shape index: {}]   ;;  %s1945_s5 = inlined_call_operand.hbm [shape: f32[8,128], index: 5, kind: output, shape index: {}]  }
   0x1   :  { %11 = vsyncpa [#allocation7], 0 }
   0x2   :  { %12 = vsyncpa [#allocation10], 0 }
   0x3   :  { %13 = vsyncpa [#allocation5], 0  ;;  %s1807_s18 = smov [#allocation6]   ;;  %s1689_s22 = scalar_lea.hbm %s1941_s1, 8192 }
   0x4   :  { %s29_s19 = sshll.u32 %s1807_s18, 4  ;;  %p1690_p0 = scmp.ne.s32.totalorder %s1941_s1, %s1689_s22  ;;  %s30_s19 = int_to_ptr.vmem [resolvable:$true] %s29_s19 }
   0x5   :  { %p1693_p1 = scmp.lt.u32.totalorder %s1689_s22, %s1941_s1 }
   0x7   :  { %p1695_p2 = pnand %p1693_p1, %p1690_p0 }
   0x9   :  { %1698 = shalt.err (!%p1695_p2)
}
   0xa   :  { %s1699_s27 = scalar_lea.vmem %s30_s19, 8192  ;;  %p1704_p4 = scmp.lt.s32.totalorder %s30_s19, %s30_s19 }
   0xb   :  { %p1700_p3 = scmp.ne.s32.totalorder %s30_s19, %s1699_s27  ;;  %p1705_p5 = scmp.lt.s32.totalorder %s1699_s27, %s1699_s27 }
   0xd   :  { %p1706_p6 = por %p1705_p5, %p1704_p4 }
   0xf   :  { %p1707_p7 = pnand %p1706_p6, %p1700_p3 }
  0x11   :  { %1710 = shalt.err (!%p1707_p7)
}
  0x12   :  { %s1808_s28 = smov 512   ;;  %s1809_s29 = smov 32  }
  0x13   :  { %35 = dma.hbm_to_vmem [thread:$0]  %s1941_s1, 8192, %s30_s19, [#allocation7], %s1808_s28, %s1808_s28, %s1809_s29  }
  0x14   :  { %s1810_s7 = smov [#allocation3]   ;;  %s1811_s9 = smov [#allocation8]  }
  0x15   :  { %s20_s8 = sshll.u32 %s1810_s7, 4  ;;  %s42_s10 = sshll.u32 %s1811_s9, 4  ;;  %s21_s8 = int_to_ptr.vmem [resolvable:$true] %s20_s8  ;;  %s43_s10 = int_to_ptr.vmem [resolvable:$true] %s42_s10 }
  0x16   :  { %s1711_s13 = scalar_lea.hbm %s1940_s0, 128 }
  0x17   :  { %p1712_p8 = scmp.ne.s32.totalorder %s1940_s0, %s1711_s13  ;;  %p1715_p9 = scmp.lt.u32.totalorder %s1711_s13, %s1940_s0 }
  0x19   :  { %p1717_p10 = pnand %p1715_p9, %p1712_p8 }
  0x1b   :  { %1720 = shalt.err (!%p1717_p10)
}
  0x1c   :  { %s1721_s1 = scalar_lea.vmem %s21_s8, 128  ;;  %p1726_p12 = scmp.lt.s32.totalorder %s21_s8, %s21_s8 }
  0x1d   :  { %p1722_p11 = scmp.ne.s32.totalorder %s21_s8, %s1721_s1  ;;  %p1727_p13 = scmp.lt.s32.totalorder %s1721_s1, %s1721_s1 }
  0x1f   :  { %p1728_p0 = por %p1727_p13, %p1726_p12 }
  0x21   :  { %p1729_p1 = pnand %p1728_p0, %p1722_p11 }
  0x23   :  { %1732 = shalt.err (!%p1729_p1)
}
  0x24   :  { %23 = dma.hbm_to_vmem [thread:$0]  %s1940_s0, 128, %s21_s8, [#allocation4]  }
  0x25   :  { %s1733_s22 = scalar_lea.hbm %s1942_s2, 128 }
  0x26   :  { %p1734_p2 = scmp.ne.s32.totalorder %s1942_s2, %s1733_s22  ;;  %p1737_p3 = scmp.lt.u32.totalorder %s1733_s22, %s1942_s2 }
  0x28   :  { %p1739_p4 = pnand %p1737_p3, %p1734_p2 }
  0x2a   :  { %1742 = shalt.err (!%p1739_p4)
}
  0x2b   :  { %s1743_s27 = scalar_lea.vmem %s43_s10, 128  ;;  %p1748_p6 = scmp.lt.s32.totalorder %s43_s10, %s43_s10 }
  0x2c   :  { %p1744_p5 = scmp.ne.s32.totalorder %s43_s10, %s1743_s27  ;;  %p1749_p7 = scmp.lt.s32.totalorder %s1743_s27, %s1743_s27 }
  0x2e   :  { %p1750_p8 = por %p1749_p7, %p1748_p6 }
  0x30   :  { %p1751_p9 = pnand %p1750_p8, %p1744_p5 }
  0x32   :  { %1754 = shalt.err (!%p1751_p9)
}
  0x33   :  { %45 = dma.hbm_to_vmem [thread:$0]  %s1942_s2, 128, %s43_s10, [#allocation7]  }
  0x34   :  { %s1812_s29 = smov [#allocation9]   ;;  %s1755_s8 = scalar_lea.hbm %s1943_s3, 8192 }
  0x35   :  { %s51_s30 = sshll.u32 %s1812_s29, 4  ;;  %p1756_p10 = scmp.ne.s32.totalorder %s1943_s3, %s1755_s8  ;;  %s52_s30 = int_to_ptr.vmem [resolvable:$true] %s51_s30 }
  0x36   :  { %p1759_p11 = scmp.lt.u32.totalorder %s1755_s8, %s1943_s3 }
  0x38   :  { %p1761_p12 = pnand %p1759_p11, %p1756_p10 }
  0x3a   :  { %1764 = shalt.err (!%p1761_p12)
}
  0x3b   :  { %s1765_s14 = scalar_lea.vmem %s52_s30, 8192  ;;  %p1770_p0 = scmp.lt.s32.totalorder %s52_s30, %s52_s30 }
  0x3c   :  { %p1766_p13 = scmp.ne.s32.totalorder %s52_s30, %s1765_s14  ;;  %p1771_p1 = scmp.lt.s32.totalorder %s1765_s14, %s1765_s14 }
  0x3e   :  { %p1772_p2 = por %p1771_p1, %p1770_p0 }
  0x40   :  { %p1773_p3 = pnand %p1772_p2, %p1766_p13 }
  0x42   :  { %1776 = shalt.err (!%p1773_p3)
}
  0x43   :  { %s1813_s2 = smov 64   ;;  %s1814_s10 = smov 4  }
  0x44   :  { %57 = dma.hbm_to_vmem [thread:$0]  %s1943_s3, 8192, %s52_s30, [#allocation10], %s1813_s2, %s1813_s2, %s1814_s10  }
  0x45   :  { %1799 = dma.done.wait [#allocation4], 128  }
  0x46   :  { %1800 = vsyncadd [#allocation4], 4294967168 }
  0x47   :  { %1801 = dma.done.wait [#allocation7], 8320  }
  0x48   :  { %1802 = vsyncadd [#allocation7], 4294958976 }
  0x49   :  { %1803 = dma.done.wait [#allocation10], 8192  }
  0x4a   :  { %1804 = vsyncadd [#allocation10], 4294959104  ;;  %v1815_v0 = vmov 0   ;;  %v79_v1 = vld [vmem:[#allocation6] sm:$0xff]  ;;  %v80_v3 = vld [vmem:[#allocation6 + $0x8] sm:$0xff] }
  0x4b   :  { %537 = vmatprep.mubr.bf16.mxu0 %v1815_v0  ;;  %578 = vmatprep.mubr.bf16.mxu1 %v1815_v0  ;;  %v83_v2 = vld [vmem:[#allocation6 + $0x20] sm:$0xff]  ;;  %v84_v5 = vld [vmem:[#allocation6 + $0x28] sm:$0xff]  ;;  %v81_v60 = vld [vmem:[#allocation6 + $0x10] sm:$0xff] }
  0x4c   :  { %v1399_v4 = vcombine.high %v79_v1, %v83_v2  ;;  %v1398_v6 = vcombine.low %v79_v1, %v83_v2  ;;  %v87_v7 = vld [vmem:[#allocation6 + $0x40] sm:$0xff]  ;;  %v1401_v9 = vcombine.high %v80_v3, %v84_v5  ;;  %v1400_v10 = vcombine.low %v80_v3, %v84_v5  ;;  %v88_v12 = vld [vmem:[#allocation6 + $0x48] sm:$0xff]  ;;  %v85_v63 = vld [vmem:[#allocation6 + $0x30] sm:$0xff] }
  0x4d   :  { %v91_v8 = vld [vmem:[#allocation6 + $0x60] sm:$0xff]  ;;  %v92_v13 = vld [vmem:[#allocation6 + $0x68] sm:$0xff]  ;;  %v77_v2 = vld [vmem:[#allocation3] sm:$0xff] }
  0x4e   :  { %v1407_v11 = vcombine.high %v87_v7, %v91_v8  ;;  %v95_v14 = vld [vmem:[#allocation6 + $0x80] sm:$0xff]  ;;  %505 = vmatprep.subr.bf16.mxu0 %v1399_v4  ;;  %v1409_v15 = vcombine.high %v88_v12, %v92_v13  ;;  %v96_v17 = vld [vmem:[#allocation6 + $0x88] sm:$0xff]  ;;  %546 = vmatprep.subr.bf16.mxu1 %v1401_v9  ;;  %v1406_v19 = vcombine.low %v87_v7, %v91_v8  ;;  %v82_v3 = vld [vmem:[#allocation6 + $0x18] sm:$0xff] }
  0x4f   :  { %v99_v16 = vld [vmem:[#allocation6 + $0xa0] sm:$0xff]  ;;  %v100_v18 = vld [vmem:[#allocation6 + $0xa8] sm:$0xff]  ;;  %506 = vmatpush1.bf16.msra.mxu0 %v1398_v6  ;;  %547 = vmatpush1.bf16.msra.mxu1 %v1400_v10  ;;  %v1408_v20 = vcombine.low %v88_v12, %v92_v13  ;;  %v86_v4 = vld [vmem:[#allocation6 + $0x38] sm:$0xff]  ;;  %v1403_v8 = vcombine.high %v81_v60, %v85_v63  ;;  %v1897_v12 = vpack.c.bf16 %v77_v2, %v77_v2 }
  0x50   :  { %507 = vmatprep.subr.bf16.mxu0 %v1407_v11  ;;  %v1415_v21 = vcombine.high %v95_v14, %v99_v16  ;;  %548 = vmatprep.subr.bf16.mxu1 %v1409_v15  ;;  %v1417_v22 = vcombine.high %v96_v17, %v100_v18  ;;  %v103_v23 = vld [vmem:[#allocation6 + $0xc0] sm:$0xff]  ;;  %v104_v25 = vld [vmem:[#allocation6 + $0xc8] sm:$0xff]  ;;  %v1414_v27 = vcombine.low %v95_v14, %v99_v16  ;;  %v89_v6 = vld [vmem:[#allocation6 + $0x50] sm:$0xff] }
  0x51   :  { %v107_v24 = vld [vmem:[#allocation6 + $0xe0] sm:$0xff]  ;;  %v108_v26 = vld [vmem:[#allocation6 + $0xe8] sm:$0xff]  ;;  %v1416_v28 = vcombine.low %v96_v17, %v100_v18  ;;  %v93_v9 = vld [vmem:[#allocation6 + $0x70] sm:$0xff]  ;;  %v1405_v10 = vcombine.high %v82_v3, %v86_v4  ;;  %v1402_v14 = vcombine.low %v81_v60, %v85_v63  ;;  %v1404_v16 = vcombine.low %v82_v3, %v86_v4 }
  0x52   :  { %v1423_v29 = vcombine.high %v103_v23, %v107_v24  ;;  %v1425_v30 = vcombine.high %v104_v25, %v108_v26  ;;  %v111_v31 = vld [vmem:[#allocation6 + $0x100] sm:$0xff]  ;;  %v112_v33 = vld [vmem:[#allocation6 + $0x108] sm:$0xff]  ;;  %v1422_v35 = vcombine.low %v103_v23, %v107_v24  ;;  %v1424_v36 = vcombine.low %v104_v25, %v108_v26  ;;  %v90_v11 = vld [vmem:[#allocation6 + $0x58] sm:$0xff] }
  0x53   :  { %508 = vmatpush1.bf16.msra.mxu0 %v1406_v19  ;;  %549 = vmatpush1.bf16.msra.mxu1 %v1408_v20  ;;  %v115_v32 = vld [vmem:[#allocation6 + $0x120] sm:$0xff]  ;;  %v116_v34 = vld [vmem:[#allocation6 + $0x128] sm:$0xff]  ;;  %v94_v13 = vld [vmem:[#allocation6 + $0x78] sm:$0xff]  ;;  %v1411_v17 = vcombine.high %v89_v6, %v93_v9 }
  0x54   :  { %509 = vmatprep.subr.bf16.mxu0 %v1415_v21  ;;  %550 = vmatprep.subr.bf16.mxu1 %v1417_v22  ;;  %v1431_v37 = vcombine.high %v111_v31, %v115_v32  ;;  %v1433_v38 = vcombine.high %v112_v33, %v116_v34  ;;  %v119_v39 = vld [vmem:[#allocation6 + $0x140] sm:$0xff]  ;;  %v120_v41 = vld [vmem:[#allocation6 + $0x148] sm:$0xff]  ;;  %v1430_v43 = vcombine.low %v111_v31, %v115_v32  ;;  %v97_v15 = vld [vmem:[#allocation6 + $0x90] sm:$0xff] }
  0x55   :  { %v123_v40 = vld [vmem:[#allocation6 + $0x160] sm:$0xff]  ;;  %v124_v42 = vld [vmem:[#allocation6 + $0x168] sm:$0xff]  ;;  %v1432_v44 = vcombine.low %v112_v33, %v116_v34  ;;  %v101_v18 = vld [vmem:[#allocation6 + $0xb0] sm:$0xff]  ;;  %v1413_v19 = vcombine.high %v90_v11, %v94_v13  ;;  %v1410_v22 = vcombine.low %v89_v6, %v93_v9  ;;  %v1412_v24 = vcombine.low %v90_v11, %v94_v13 }
  0x56   :  { %v1439_v45 = vcombine.high %v119_v39, %v123_v40  ;;  %v1441_v46 = vcombine.high %v120_v41, %v124_v42  ;;  %v127_v47 = vld [vmem:[#allocation6 + $0x180] sm:$0xff]  ;;  %v128_v49 = vld [vmem:[#allocation6 + $0x188] sm:$0xff]  ;;  %v1438_v51 = vcombine.low %v119_v39, %v123_v40  ;;  %v1440_v52 = vcombine.low %v120_v41, %v124_v42  ;;  %v98_v20 = vld [vmem:[#allocation6 + $0x98] sm:$0xff] }
  0x57   :  { %510 = vmatpush1.bf16.msra.mxu0 %v1414_v27  ;;  %551 = vmatpush1.bf16.msra.mxu1 %v1416_v28  ;;  %v131_v48 = vld [vmem:[#allocation6 + $0x1a0] sm:$0xff]  ;;  %v132_v50 = vld [vmem:[#allocation6 + $0x1a8] sm:$0xff]  ;;  %v102_v21 = vld [vmem:[#allocation6 + $0xb8] sm:$0xff]  ;;  %v1419_v25 = vcombine.high %v97_v15, %v101_v18 }
  0x58   :  { %511 = vmatprep.subr.bf16.mxu0 %v1423_v29  ;;  %552 = vmatprep.subr.bf16.mxu1 %v1425_v30  ;;  %v1447_v53 = vcombine.high %v127_v47, %v131_v48  ;;  %v135_v54 = vld [vmem:[#allocation6 + $0x1c0] sm:$0xff]  ;;  %v1449_v56 = vcombine.high %v128_v49, %v132_v50  ;;  %v136_v57 = vld [vmem:[#allocation6 + $0x1c8] sm:$0xff]  ;;  %v1446_v59 = vcombine.low %v127_v47, %v131_v48  ;;  %v105_v23 = vld [vmem:[#allocation6 + $0xd0] sm:$0xff] }
  0x59   :  { %v139_v55 = vld [vmem:[#allocation6 + $0x1e0] sm:$0xff]  ;;  %v140_v58 = vld [vmem:[#allocation6 + $0x1e8] sm:$0xff]  ;;  %v1448_v61 = vcombine.low %v128_v49, %v132_v50  ;;  %v109_v26 = vld [vmem:[#allocation6 + $0xf0] sm:$0xff]  ;;  %v1421_v27 = vcombine.high %v98_v20, %v102_v21  ;;  %v1418_v30 = vcombine.low %v97_v15, %v101_v18  ;;  %v1420_v32 = vcombine.low %v98_v20, %v102_v21 }
  0x5a   :  { %v1455_v62 = vcombine.high %v135_v54, %v139_v55  ;;  %v1457_v1 = vcombine.high %v136_v57, %v140_v58  ;;  %v1454_v5 = vcombine.low %v135_v54, %v139_v55  ;;  %v1456_v7 = vcombine.low %v136_v57, %v140_v58  ;;  %v106_v28 = vld [vmem:[#allocation6 + $0xd8] sm:$0xff]  ;;  %v113_v31 = vld [vmem:[#allocation6 + $0x110] sm:$0xff]  ;;  %v1625_v2 = vld [vmem:[#allocation9 + $0x40] sm:$0xff]  }
  0x5b   :  { %512 = vmatpush1.bf16.msra.mxu0 %v1422_v35  ;;  %553 = vmatpush1.bf16.msra.mxu1 %v1424_v36  ;;  %v110_v29 = vld [vmem:[#allocation6 + $0xf8] sm:$0xff]  ;;  %v1427_v33 = vcombine.high %v105_v23, %v109_v26  ;;  %v117_v34 = vld [vmem:[#allocation6 + $0x130] sm:$0xff]  ;;  %v1626_v4 = vld [vmem:[#allocation9 + $0xc0] sm:$0xff]  }
  0x5c   :  { %513 = vmatprep.subr.bf16.mxu0 %v1431_v37  ;;  %554 = vmatprep.subr.bf16.mxu1 %v1433_v38  ;;  %v1429_v35 = vcombine.high %v106_v28, %v110_v29  ;;  %v114_v36 = vld [vmem:[#allocation6 + $0x118] sm:$0xff]  ;;  %v1426_v38 = vcombine.low %v105_v23, %v109_v26  ;;  %v121_v39 = vld [vmem:[#allocation6 + $0x150] sm:$0xff]  ;;  %v1428_v41 = vcombine.low %v106_v28, %v110_v29  ;;  %v1627_v6 = vld [vmem:[#allocation9] sm:$0xff]  }
  0x5d   :  { %v118_v37 = vld [vmem:[#allocation6 + $0x138] sm:$0xff]  ;;  %v125_v40 = vld [vmem:[#allocation6 + $0x170] sm:$0xff]  ;;  %v1638_v18 = vld [vmem:[#allocation9 + $0xd8] sm:$0xff]  }
  0x5e   :  { %v122_v42 = vld [vmem:[#allocation6 + $0x158] sm:$0xff]  ;;  %v133_v47 = vld [vmem:[#allocation6 + $0x1b0] sm:$0xff]  ;;  %v1436_v48 = vcombine.low %v114_v36, %v118_v37  ;;  %v1443_v49 = vcombine.high %v121_v39, %v125_v40  ;;  %v1640_v20 = vld [vmem:[#allocation9 + $0x98] sm:$0xff]  }
  0x5f   :  { %514 = vmatpush1.bf16.msra.mxu0 %v1430_v43  ;;  %555 = vmatpush1.bf16.msra.mxu1 %v1432_v44  ;;  %v126_v43 = vld [vmem:[#allocation6 + $0x178] sm:$0xff]  ;;  %v1437_v44 = vcombine.high %v114_v36, %v118_v37  ;;  %v137_v54 = vld [vmem:[#allocation6 + $0x1d0] sm:$0xff]  ;;  %v1641_v21 = vld [vmem:[#allocation9 + $0x60] sm:$0xff]  }
  0x60   :  { %515 = vmatprep.subr.bf16.mxu0 %v1439_v45  ;;  %556 = vmatprep.subr.bf16.mxu1 %v1441_v46  ;;  %v1434_v45 = vcombine.low %v113_v31, %v117_v34  ;;  %v129_v46 = vld [vmem:[#allocation6 + $0x190] sm:$0xff]  ;;  %v130_v50 = vld [vmem:[#allocation6 + $0x198] sm:$0xff]  ;;  %v1644_v23 = vld [vmem:[#allocation9 + $0xa0] sm:$0xff]  }
  0x61   :  { %v141_v55 = vld [vmem:[#allocation6 + $0x1f0] sm:$0xff]  ;;  %v1451_v57 = vcombine.high %v129_v46, %v133_v47  ;;  %v138_v58 = vld [vmem:[#allocation6 + $0x1d8] sm:$0xff]  ;;  %v1657_v36 = vld [vmem:[#allocation9 + $0x140] sm:$0xff]  }
  0x62   :  { %v1459_v63 = vcombine.high %v137_v54, %v141_v55  ;;  %v1458_v3 = vcombine.low %v137_v54, %v141_v55  ;;  %v1630_v9 = vld [vmem:[#allocation9 + $0xc8] sm:$0xff]   ;;  %v1633_v13 = vld [vmem:[#allocation9 + $0x50] sm:$0xff]   ;;  %v1658_v37 = vld [vmem:[#allocation9 + $0x1c0] sm:$0xff]  }
  0x63   :  { %516 = vmatpush1.bf16.msra.mxu0 %v1438_v51  ;;  %557 = vmatpush1.bf16.msra.mxu1 %v1440_v52  ;;  %v134_v51 = vld [vmem:[#allocation6 + $0x1b8] sm:$0xff]  ;;  %v1445_v52 = vcombine.high %v122_v42, %v126_v43  ;;  %v1632_v11 = vld [vmem:[#allocation9 + $0x88] sm:$0xff]  }
  0x64   :  { %517 = vmatprep.subr.bf16.mxu0 %v1447_v53  ;;  %558 = vmatprep.subr.bf16.mxu1 %v1449_v56  ;;  %v1442_v53 = vcombine.low %v121_v39, %v125_v40  ;;  %v1444_v56 = vcombine.low %v122_v42, %v126_v43  ;;  %v1453_v60 = vcombine.high %v130_v50, %v134_v51  ;;  %v1635_v15 = vld [vmem:[#allocation9 + $0x10] sm:$0xff]   ;;  %v1647_v26 = vld [vmem:[#allocation9 + $0x28] sm:$0xff]  }
  0x65   :  { %v1649_v28 = vld [vmem:[#allocation9 + $0x70] sm:$0xff]  }
  0x66   :  { %v1650_v29 = vld [vmem:[#allocation9 + $0xf0] sm:$0xff]  }
  0x67   :  { %518 = vmatpush1.bf16.msra.mxu0 %v1446_v59  ;;  %559 = vmatpush1.bf16.msra.mxu1 %v1448_v61  ;;  %v142_v59 = vld [vmem:[#allocation6 + $0x1f8] sm:$0xff]  ;;  %v1450_v61 = vcombine.low %v129_v46, %v133_v47 }
  0x68   :  { %519 = vmatprep.subr.bf16.mxu0 %v1455_v62  ;;  %560 = vmatprep.subr.bf16.mxu1 %v1457_v1  ;;  %v1452_v62 = vcombine.low %v130_v50, %v134_v51  ;;  %v1461_v1 = vcombine.high %v138_v58, %v142_v59 }
  0x6b   :  { %520 = vmatpush1.bf16.msra.mxu0 %v1454_v5  ;;  %561 = vmatpush1.bf16.msra.mxu1 %v1456_v7  ;;  %v1460_v5 = vcombine.low %v138_v58, %v142_v59  ;;  %v1628_v7 = vld [vmem:[#allocation9 + $0x80] sm:$0xff]  }
  0x6c   :  { %587 = vmatprep.subr.bf16.mxu0 %v1403_v8  ;;  %628 = vmatprep.subr.bf16.mxu1 %v1405_v10  ;;  %v1629_v8 = vld [vmem:[#allocation9 + $0x48] sm:$0xff]  }
  0x6d   :  { %v1631_v10 = vld [vmem:[#allocation9 + $0x8] sm:$0xff]  }
  0x6e   :  { %538 = vmatmul.mubr.bf16.vlgmr.msra.gmra.mrb[0].mxu0 %v1897_v12  ;;  %579 = vmatmul.mubr.bf16.vlgmr.msra.gmra.mrb[0].mxu1 %v1897_v12 }
  0x6f   :  { %588 = vmatpush1.bf16.msra.mxu0 %v1402_v14  ;;  %629 = vmatpush1.bf16.msra.mxu1 %v1404_v16  ;;  %v1634_v14 = vld [vmem:[#allocation9 + $0xd0] sm:$0xff]  }
  0x70   :  { %589 = vmatprep.subr.bf16.mxu0 %v1411_v17  ;;  %630 = vmatprep.subr.bf16.mxu1 %v1413_v19  ;;  %v1636_v16 = vld [vmem:[#allocation9 + $0x90] sm:$0xff]   ;;  %v1637_v17 = vld [vmem:[#allocation9 + $0x58] sm:$0xff]  }
  0x71   :  { %619 = vmatprep.mubr.bf16.mxu0 %v1815_v0  ;;  %660 = vmatprep.mubr.bf16.mxu1 %v1815_v0  ;;  %v1435_v0 = vcombine.high %v113_v31, %v117_v34  ;;  %v1639_v19 = vld [vmem:[#allocation9 + $0x18] sm:$0xff]   ;;  %v1652_v31 = vld [vmem:[#allocation9 + $0xb0] sm:$0xff]  }
  0x72   :  { %v1655_v34 = vld [vmem:[#allocation9 + $0x38] sm:$0xff]  }
  0x73   :  { %590 = vmatpush1.bf16.msra.mxu0 %v1410_v22  ;;  %631 = vmatpush1.bf16.msra.mxu1 %v1412_v24  ;;  %v1643_v22 = vld [vmem:[#allocation9 + $0x20] sm:$0xff]   ;;  %v1645_v24 = vld [vmem:[#allocation9 + $0x68] sm:$0xff]  }
  0x74   :  { %591 = vmatprep.subr.bf16.mxu0 %v1419_v25  ;;  %632 = vmatprep.subr.bf16.mxu1 %v1421_v27  ;;  %v1646_v25 = vld [vmem:[#allocation9 + $0xe8] sm:$0xff]  }
  0x75   :  { %v1648_v27 = vld [vmem:[#allocation9 + $0xa8] sm:$0xff]  }
  0x77   :  { %592 = vmatpush1.bf16.msra.mxu0 %v1418_v30  ;;  %633 = vmatpush1.bf16.msra.mxu1 %v1420_v32  ;;  %v1651_v30 = vld [vmem:[#allocation9 + $0x30] sm:$0xff]   ;;  %v1653_v32 = vld [vmem:[#allocation9 + $0x78] sm:$0xff]  }
  0x78   :  { %593 = vmatprep.subr.bf16.mxu0 %v1427_v33  ;;  %634 = vmatprep.subr.bf16.mxu1 %v1429_v35  ;;  %v1654_v33 = vld [vmem:[#allocation9 + $0xf8] sm:$0xff]  }
  0x79   :  { %v1656_v35 = vld [vmem:[#allocation9 + $0xb8] sm:$0xff]  }
  0x7b   :  { %594 = vmatpush1.bf16.msra.mxu0 %v1426_v38  ;;  %635 = vmatpush1.bf16.msra.mxu1 %v1428_v41  ;;  %v145_v38 = vlaneseq  ;;  %v1908_v41 = vld [vmem:[#allocation8] sm:$0xff] }
  0x7c   :  { %595 = vmatprep.subr.bf16.mxu0 %v1435_v0  ;;  %636 = vmatprep.subr.bf16.mxu1 %v1437_v44 }
  0x7d   :  { %v1905_v39 = vshrl.u32 %v145_v38, 7  ;;  %v1684_v38 = vld [vmem:[#allocation9 + $0x1b0] sm:$0xff]  }
  0x7f   :  { %596 = vmatpush1.bf16.msra.mxu0 %v1434_v45  ;;  %637 = vmatpush1.bf16.msra.mxu1 %v1436_v48  ;;  %v147_v40 = vsub.s32 0, %v1905_v39  ;;  %v155_v0 = vsub.s32 2, %v1905_v39  ;;  %v151_v42 = vsub.s32 1, %v1905_v39  ;;  %v159_v43 = vsub.s32 3, %v1905_v39 }
  0x80   :  { %597 = vmatprep.subr.bf16.mxu0 %v1443_v49  ;;  %638 = vmatprep.subr.bf16.mxu1 %v1445_v52 }
  0x81   :  { %v148_v44 = vrot.slane %v1908_v41, %v147_v40  ;;  %v156_v45 = vrot.slane %v1908_v41, %v155_v0  ;;  %v152_v46 = vrot.slane %v1908_v41, %v151_v42  ;;  %v160_v47 = vrot.slane %v1908_v41, %v159_v43  ;;  %v1685_v40 = vld [vmem:[#allocation9 + $0x178] sm:$0xff]  }
  0x83   :  { %598 = vmatpush1.bf16.msra.mxu0 %v1442_v53  ;;  %639 = vmatpush1.bf16.msra.mxu1 %v1444_v56 }
  0x84   :  { %599 = vmatprep.subr.bf16.mxu0 %v1451_v57  ;;  %640 = vmatprep.subr.bf16.mxu1 %v1453_v60 }
  0x87   :  { %600 = vmatpush1.bf16.msra.mxu0 %v1450_v61  ;;  %641 = vmatpush1.bf16.msra.mxu1 %v1452_v62 }
  0x88   :  { %601 = vmatprep.subr.bf16.mxu0 %v1459_v63  ;;  %642 = vmatprep.subr.bf16.mxu1 %v1461_v1 }
  0x8b   :  { %602 = vmatpush1.bf16.msra.mxu0 %v1458_v3  ;;  %643 = vmatpush1.bf16.msra.mxu1 %v1460_v5 }
  0x8c   :  { %1527 = vmatprep.subr.bf16.mxu0 %v1625_v2  ;;  %1549 = vmatprep.subr.bf16.mxu1 %v1626_v4  ;;  %v1659_v4 = vld [vmem:[#allocation9 + $0x100] sm:$0xff]  }
  0x8e   :  { %620 = vmatmul.mubr.bf16.vlgmr.msra.gmra.mrb[4].mxu0 %v1897_v12  ;;  %661 = vmatmul.mubr.bf16.vlgmr.msra.gmra.mrb[4].mxu1 %v1897_v12  ;;  %v1642_v12 = vld [vmem:[#allocation9 + $0xe0] sm:$0xff]  }
  0x8f   :  { %1528 = vmatpush3.bf16.msra.mxu0 %v1627_v6  ;;  %1550 = vmatpush3.bf16.msra.mxu1 %v1628_v7  ;;  %v1660_v6 = vld [vmem:[#allocation9 + $0x180] sm:$0xff]   ;;  %v1661_v7 = vld [vmem:[#allocation9 + $0x148] sm:$0xff]  }
  0x90   :  { %1529 = vmatprep.subr.bf16.mxu0 %v1629_v8  ;;  %1551 = vmatprep.subr.bf16.mxu1 %v1630_v9  ;;  %v1662_v8 = vld [vmem:[#allocation9 + $0x1c8] sm:$0xff]  }
  0x91   :  { %v1663_v9 = vld [vmem:[#allocation9 + $0x108] sm:$0xff]  }
  0x93   :  { %1530 = vmatpush3.bf16.msra.mxu0 %v1631_v10  ;;  %1552 = vmatpush3.bf16.msra.mxu1 %v1632_v11  ;;  %v1664_v10 = vld [vmem:[#allocation9 + $0x188] sm:$0xff]   ;;  %v1665_v11 = vld [vmem:[#allocation9 + $0x150] sm:$0xff]  }
  0x94   :  { %1531 = vmatprep.subr.bf16.mxu0 %v1633_v13  ;;  %1553 = vmatprep.subr.bf16.mxu1 %v1634_v14  ;;  %v1666_v13 = vld [vmem:[#allocation9 + $0x1d0] sm:$0xff]  }
  0x95   :  { %v1667_v14 = vld [vmem:[#allocation9 + $0x110] sm:$0xff]  }
  0x97   :  { %1532 = vmatpush3.bf16.msra.mxu0 %v1635_v15  ;;  %1554 = vmatpush3.bf16.msra.mxu1 %v1636_v16  ;;  %v1668_v15 = vld [vmem:[#allocation9 + $0x190] sm:$0xff]   ;;  %v1669_v16 = vld [vmem:[#allocation9 + $0x158] sm:$0xff]  }
  0x98   :  { %1533 = vmatprep.subr.bf16.mxu0 %v1637_v17  ;;  %1555 = vmatprep.subr.bf16.mxu1 %v1638_v18  ;;  %v1670_v17 = vld [vmem:[#allocation9 + $0x1d8] sm:$0xff]  }
  0x99   :  { %v1671_v18 = vld [vmem:[#allocation9 + $0x118] sm:$0xff]  }
  0x9b   :  { %1534 = vmatpush3.bf16.msra.mxu0 %v1639_v19  ;;  %1556 = vmatpush3.bf16.msra.mxu1 %v1640_v20  ;;  %v1672_v19 = vld [vmem:[#allocation9 + $0x198] sm:$0xff]   ;;  %v1673_v20 = vld [vmem:[#allocation9 + $0x160] sm:$0xff]  }
  0x9c   :  { %1535 = vmatprep.subr.bf16.mxu0 %v1641_v21  ;;  %1557 = vmatprep.subr.bf16.mxu1 %v1642_v12  ;;  %v1674_v21 = vld [vmem:[#allocation9 + $0x1e0] sm:$0xff]  }
  0x9d   :  { %v1675_v12 = vld [vmem:[#allocation9 + $0x120] sm:$0xff]  }
  0x9f   :  { %1536 = vmatpush3.bf16.msra.mxu0 %v1643_v22  ;;  %1558 = vmatpush3.bf16.msra.mxu1 %v1644_v23  ;;  %v1676_v22 = vld [vmem:[#allocation9 + $0x1a0] sm:$0xff]   ;;  %v1677_v23 = vld [vmem:[#allocation9 + $0x168] sm:$0xff]  }
  0xa0   :  { %1537 = vmatprep.subr.bf16.mxu0 %v1645_v24  ;;  %1559 = vmatprep.subr.bf16.mxu1 %v1646_v25  ;;  %v1678_v24 = vld [vmem:[#allocation9 + $0x1e8] sm:$0xff]   ;;  %v163_v25 = vsub.s32 4, %v1905_v39 }
  0xa3   :  { %1538 = vmatpush3.bf16.msra.mxu0 %v1647_v26  ;;  %1560 = vmatpush3.bf16.msra.mxu1 %v1648_v27  ;;  %v1679_v26 = vld [vmem:[#allocation9 + $0x128] sm:$0xff]   ;;  %v171_v27 = vsub.s32 6, %v1905_v39 }
  0xa4   :  { %1539 = vmatprep.subr.bf16.mxu0 %v1649_v28  ;;  %1561 = vmatprep.subr.bf16.mxu1 %v1650_v29  ;;  %v167_v28 = vsub.s32 5, %v1905_v39  ;;  %v1680_v29 = vld [vmem:[#allocation9 + $0x1a8] sm:$0xff]  }
  0xa7   :  { %1540 = vmatpush3.bf16.msra.mxu0 %v1651_v30  ;;  %1562 = vmatpush3.bf16.msra.mxu1 %v1652_v31  ;;  %v175_v30 = vsub.s32 7, %v1905_v39  ;;  %v1681_v31 = vld [vmem:[#allocation9 + $0x170] sm:$0xff]   ;;  %v1686_v39 = vld [vmem:[#allocation9 + $0x1f8] sm:$0xff]  }
  0xa8   :  { %1541 = vmatprep.subr.bf16.mxu0 %v1653_v32  ;;  %1563 = vmatprep.subr.bf16.mxu1 %v1654_v33  ;;  %v1682_v32 = vld [vmem:[#allocation9 + $0x1f0] sm:$0xff]   ;;  %v164_v33 = vrot.slane %v1908_v41, %v163_v25 }
  0xab   :  { %1542 = vmatpush3.bf16.msra.mxu0 %v1655_v34  ;;  %1564 = vmatpush3.bf16.msra.mxu1 %v1656_v35  ;;  %v172_v34 = vrot.slane %v1908_v41, %v171_v27  ;;  %v168_v35 = vrot.slane %v1908_v41, %v167_v28 }
  0xac   :  { %1571 = vmatprep.subr.bf16.mxu0 %v1657_v36  ;;  %1593 = vmatprep.subr.bf16.mxu1 %v1658_v37  ;;  %v1683_v36 = vld [vmem:[#allocation9 + $0x130] sm:$0xff]   ;;  %v176_v37 = vrot.slane %v1908_v41, %v175_v30 }
 0x141   :  { %v539_v48 = vpop.f32.mrb[0].mxu0  ;;  %v580_v50 = vpop.f32.mrb[0].mxu1 }
 0x142   :  { %v540_v49 = vadd.f32 %v539_v48, %v148_v44  ;;  %v541_v51 = vpop.f32.mrb[1].mxu0  ;;  %v581_v52 = vadd.f32 %v580_v50, %v156_v45  ;;  %v582_v54 = vpop.f32.mrb[1].mxu1 }
 0x143   :  { %v542_v53 = vadd.f32 %v541_v51, %v152_v46  ;;  %v543_v55 = vpop.f32.mrb[2].mxu0  ;;  %v583_v57 = vadd.f32 %v582_v54, %v160_v47  ;;  %v584_v58 = vpop.f32.mrb[2].mxu1 }
 0x144   :  { %v669_v56 = vmax.f32 %v540_v49, 0.0  ;;  %v544_v59 = vpop.f32.mrb[3].mxu0  ;;  %v671_v60 = vmax.f32 %v581_v52, 0.0  ;;  %v585_v62 = vpop.f32.mrb[3].mxu1  ;;  %v1687_v49 = vld [vmem:[#allocation9 + $0x138] sm:$0xff]  }
 0x145   :  { %v670_v61 = vmax.f32 %v542_v53, 0.0  ;;  %v672_v1 = vmax.f32 %v583_v57, 0.0  ;;  %v1688_v53 = vld [vmem:[#allocation9 + $0x1b8] sm:$0xff]  }
 0x146   :  { %v693_v63 = vpack.c.bf16 %v669_v56, %v669_v56  ;;  %v695_v2 = vpack.c.bf16 %v671_v60, %v671_v60 }
 0x147   :  { %v694_v3 = vpack.c.bf16 %v670_v61, %v670_v61  ;;  %v696_v5 = vpack.c.bf16 %v672_v1, %v672_v1  ;;  %v1462_v1 = vld [vmem:[%s1944_s4] ss:$0 sm:$0xff]  ;;  %s1816_s4 = smov [#allocation11]  }
 0x148   :  { %s1387_s1 = sshll.u32 %s1816_s4, 4  ;;  %s1388_s1 = int_to_ptr.vmem [resolvable:$true] %s1387_s1 }
 0x149   :  { %1252 = vmatprep.mubr.bf16.mxu0 %v694_v3  ;;  %1292 = vmatprep.mubr.bf16.mxu1 %v696_v5  ;;  %s1777_s18 = scalar_lea.vmem %s1388_s1, 128  ;;  %p1782_p5 = scmp.lt.s32.totalorder %s1388_s1, %s1388_s1 }
 0x14a   :  { %1253 = vmatmul.mubr.bf16.vlgmr.msra.gmra.mrb[8].mxu0 %v693_v63  ;;  %1293 = vmatmul.mubr.bf16.vlgmr.msra.gmra.mrb[8].mxu1 %v695_v2  ;;  %p1778_p4 = scmp.ne.s32.totalorder %s1388_s1, %s1777_s18  ;;  %p1783_p6 = scmp.lt.s32.totalorder %s1777_s18, %s1777_s18 }
 0x14b   :  { %1572 = vmatpush3.bf16.msra.mxu0 %v1659_v4  ;;  %1594 = vmatpush3.bf16.msra.mxu1 %v1660_v6 }
 0x14c   :  { %1573 = vmatprep.subr.bf16.mxu0 %v1661_v7  ;;  %1595 = vmatprep.subr.bf16.mxu1 %v1662_v8  ;;  %p1784_p7 = por %p1783_p6, %p1782_p5 }
 0x14e   :  { %p1785_p8 = pnand %p1784_p7, %p1778_p4 }
 0x14f   :  { %1574 = vmatpush3.bf16.msra.mxu0 %v1663_v9  ;;  %1596 = vmatpush3.bf16.msra.mxu1 %v1664_v10 }
 0x150   :  { %1575 = vmatprep.subr.bf16.mxu0 %v1665_v11  ;;  %1597 = vmatprep.subr.bf16.mxu1 %v1666_v13 }
 0x153   :  { %1576 = vmatpush3.bf16.msra.mxu0 %v1667_v14  ;;  %1598 = vmatpush3.bf16.msra.mxu1 %v1668_v15 }
 0x154   :  { %1577 = vmatprep.subr.bf16.mxu0 %v1669_v16  ;;  %1599 = vmatprep.subr.bf16.mxu1 %v1670_v17 }
 0x157   :  { %1578 = vmatpush3.bf16.msra.mxu0 %v1671_v18  ;;  %1600 = vmatpush3.bf16.msra.mxu1 %v1672_v19 }
 0x158   :  { %1579 = vmatprep.subr.bf16.mxu0 %v1673_v20  ;;  %1601 = vmatprep.subr.bf16.mxu1 %v1674_v21 }
 0x15b   :  { %1580 = vmatpush3.bf16.msra.mxu0 %v1675_v12  ;;  %1602 = vmatpush3.bf16.msra.mxu1 %v1676_v22 }
 0x15c   :  { %1581 = vmatprep.subr.bf16.mxu0 %v1677_v23  ;;  %1603 = vmatprep.subr.bf16.mxu1 %v1678_v24 }
 0x15f   :  { %1582 = vmatpush3.bf16.msra.mxu0 %v1679_v26  ;;  %1604 = vmatpush3.bf16.msra.mxu1 %v1680_v29 }
 0x160   :  { %1583 = vmatprep.subr.bf16.mxu0 %v1681_v31  ;;  %1605 = vmatprep.subr.bf16.mxu1 %v1682_v32 }
 0x161   :  { %v621_v0 = vpop.f32.mrb[4].mxu0  ;;  %v662_v43 = vpop.f32.mrb[4].mxu1 }
 0x162   :  { %v622_v42 = vadd.f32 %v621_v0, %v164_v33  ;;  %v623_v44 = vpop.f32.mrb[5].mxu0  ;;  %v663_v45 = vadd.f32 %v662_v43, %v172_v34  ;;  %v664_v47 = vpop.f32.mrb[5].mxu1 }
 0x163   :  { %v624_v46 = vadd.f32 %v623_v44, %v168_v35  ;;  %v625_v48 = vpop.f32.mrb[6].mxu0  ;;  %1584 = vmatpush3.bf16.msra.mxu0 %v1683_v36  ;;  %v665_v51 = vadd.f32 %v664_v47, %v176_v37  ;;  %v666_v52 = vpop.f32.mrb[6].mxu1  ;;  %1606 = vmatpush3.bf16.msra.mxu1 %v1684_v38 }
 0x164   :  { %v673_v50 = vmax.f32 %v622_v42, 0.0  ;;  %v626_v41 = vpop.f32.mrb[7].mxu0  ;;  %1585 = vmatprep.subr.bf16.mxu0 %v1685_v40  ;;  %v675_v54 = vmax.f32 %v663_v45, 0.0  ;;  %v667_v56 = vpop.f32.mrb[7].mxu1  ;;  %1607 = vmatprep.subr.bf16.mxu1 %v1686_v39 }
 0x165   :  { %v674_v55 = vmax.f32 %v624_v46, 0.0  ;;  %v676_v57 = vmax.f32 %v665_v51, 0.0 }
 0x166   :  { %v699_v58 = vpack.c.bf16 %v675_v54, %v675_v54  ;;  %v697_v60 = vpack.c.bf16 %v673_v50, %v673_v50 }
 0x167   :  { %v698_v59 = vpack.c.bf16 %v674_v55, %v674_v55  ;;  %1586 = vmatpush3.bf16.msra.mxu0 %v1687_v49  ;;  %v700_v61 = vpack.c.bf16 %v676_v57, %v676_v57  ;;  %1608 = vmatpush3.bf16.msra.mxu1 %v1688_v53 }
 0x169   :  { %1332 = vmatprep.mubr.bf16.mxu0 %v698_v59  ;;  %1372 = vmatprep.mubr.bf16.mxu1 %v700_v61 }
 0x16a   :  { %1333 = vmatmul.mubr.bf16.vlgmr.msra.gmra.mrb[12].mxu0 %v697_v60  ;;  %1373 = vmatmul.mubr.bf16.vlgmr.msra.gmra.mrb[12].mxu1 %v699_v58 }
 0x21d   :  { %v1543_v62 = vpop.f32.mrb[8].mxu0  ;;  %v1565_v63 = vpop.f32.mrb[8].mxu1 }
 0x21e   :  { %v1544_v2 = vpop.f32.mrb[9].mxu0  ;;  %v1566_v4 = vpop.f32.mrb[9].mxu1 }
 0x21f   :  { %v1545_v3 = vadd.f32 %v1544_v2, %v1543_v62  ;;  %v1546_v5 = vpop.f32.mrb[10].mxu0  ;;  %v1567_v6 = vadd.f32 %v1566_v4, %v1565_v63  ;;  %v1568_v7 = vpop.f32.mrb[10].mxu1 }
 0x220   :  { %v1547_v8 = vpop.f32.mrb[11].mxu0  ;;  %v1569_v10 = vpop.f32.mrb[11].mxu1 }
 0x221   :  { %v1255_v9 = vadd.f32 %v1545_v3, %v1462_v1 }
 0x223   :  { %v1295_v11 = vadd.f32 %v1567_v6, %v1255_v9 }
 0x23d   :  { %v1587_v13 = vpop.f32.mrb[12].mxu0  ;;  %v1609_v14 = vpop.f32.mrb[12].mxu1 }
 0x23e   :  { %v1588_v15 = vpop.f32.mrb[13].mxu0  ;;  %v1610_v17 = vpop.f32.mrb[13].mxu1 }
 0x23f   :  { %v1589_v16 = vadd.f32 %v1588_v15, %v1587_v13  ;;  %v1590_v18 = vpop.f32.mrb[14].mxu0  ;;  %v1611_v19 = vadd.f32 %v1610_v17, %v1609_v14  ;;  %v1612_v20 = vpop.f32.mrb[14].mxu1 }
 0x240   :  { %v1591_v21 = vpop.f32.mrb[15].mxu0  ;;  %v1613_v22 = vpop.f32.mrb[15].mxu1 }
 0x241   :  { %v1335_v12 = vadd.f32 %v1589_v16, %v1295_v11 }
 0x243   :  { %v1375_v23 = vadd.f32 %v1611_v19, %v1335_v12 }
 0x245   :  { %1380 = vst [vmem:[#allocation11] sm:$0xff] %v1375_v23 }
 0x246   :  { %1788 = shalt.err (!%p1785_p8)
}
 0x247   :  { %s1789_s21 = scalar_lea.hbm %s1945_s5, 128 }
 0x248   :  { %p1790_p9 = scmp.ne.s32.totalorder %s1945_s5, %s1789_s21  ;;  %p1793_p10 = scmp.lt.u32.totalorder %s1789_s21, %s1945_s5 }
 0x24a   :  { %p1795_p11 = pnand %p1793_p10, %p1790_p9 }
 0x24c   :  { %1798 = shalt.err (!%p1795_p11)
}
 0x24d   :  { %1390 = dma.vmem_to_hbm [thread:$0]  %s1388_s1, 128, %s1945_s5, [#allocation5]  }
 0x24e   :  { %1805 = dma.done.wait [#allocation5], 128  }
 0x24f   :  { %1806 = vsyncadd [#allocation5], 4294967168 }
 0x250   :  { %1394 = vsyncpa [#allocation4], 1 }
 0x251   :  { %1395 = vsyncpa [#allocation7], 1 }
 0x252   :  { %1396 = vsyncpa [#allocation10], 1 }
 0x253   :  { %1397 = vsyncpa [#allocation5], 1 }

</bundles_post_ra>
